<compile_context>
chip_gen: v6e
topology: v6e:2x2x1
jax: 0.10.0
libtpu: 0.0.40
codegen_flags: <defaults>
</compile_context>

<pallas_src>
import functools

import jax
import jax.numpy as jnp
from jax.experimental import pallas as pl
from jax.experimental.pallas import tpu as pltpu


def _group_norm1_kernel(x_ref, g_ref, b_ref, o_ref, *, eps: float, inv_n: float):
    # x_ref: (TB, R, L) -- TB full samples, R*L == C*H*W per sample.
    # g_ref / b_ref: (1, R, L) (lane-dense repacked affine) or (1, C, 1).
    x = x_ref[...].astype(jnp.float32)

    # Single pass over the data: sum and sum-of-squares in one read.
    s = jnp.sum(x, axis=(1, 2), keepdims=True)          # (TB, 1, 1)
    ss = jnp.sum(x * x, axis=(1, 2), keepdims=True)     # (TB, 1, 1)
    mean = s * inv_n
    var = jnp.maximum(ss * inv_n - mean * mean, 0.0)    # clamp for stability
    inv = jax.lax.rsqrt(var + eps)                      # (TB, 1, 1)

    g = g_ref[...].astype(jnp.float32)
    b = b_ref[...].astype(jnp.float32)
    a = g * inv                                         # fused scale
    c = b - mean * a                                    # fused shift
    o_ref[...] = (x * a + c).astype(o_ref.dtype)


def _pick_batch_tile(batch: int, per_sample_bytes: int,
                     target_bytes: int = 2 << 20) -> int:
    """Largest divisor of `batch` keeping a block <= ~target_bytes; prefer an
    even number of grid steps (v7x dual TensorCore)."""
    max_tb = max(1, target_bytes // max(per_sample_bytes, 1))
    tb = 1
    for d in range(1, batch + 1):
        if batch % d == 0 and d <= max_tb:
            tb = d
    if tb % 2 == 0 and (batch // tb) % 2 == 1:
        tb //= 2
    return tb


def pre_norm(x, weight, bias, fn=None, *, eps: float = 1e-5):
    """PreNorm forward: fn(GroupNorm(1, C)(x)).

    x:      (B, C, H, W)
    weight: (C,) GroupNorm affine scale
    bias:   (C,) GroupNorm affine shift
    fn:     optional JAX callable applied to the normalized tensor.
    """
    B, C, H, W = x.shape
    HW = H * W
    n = C * HW
    itemsize = jnp.dtype(x.dtype).itemsize
    TB = _pick_batch_tile(B, n * itemsize)

    if n % 128 == 0:
        # Lane-dense repack: (B, C*HW/128, 128); gamma/beta pre-broadcast to the
        # same per-sample layout so the kernel needs no sublane broadcast.
        R, L = n // 128, 128
        x3 = x.reshape(B, R, L)
        g3 = jnp.broadcast_to(weight.reshape(C, 1).astype(jnp.float32),
                              (C, HW)).reshape(1, R, L)
        b3 = jnp.broadcast_to(bias.reshape(C, 1).astype(jnp.float32),
                              (C, HW)).reshape(1, R, L)
        aff_block = (1, R, L)
    else:
        # TODO(synk): for shapes where C*H*W is not a multiple of 128 this path
        # keeps the natural (C, HW) layout (masked stores); a padded+masked
        # lane-dense repack (excluding padding from sum/sumsq and n) is the
        # remaining optimization.
        R, L = C, HW
        x3 = x.reshape(B, R, L)
        g3 = weight.reshape(1, C, 1).astype(jnp.float32)
        b3 = bias.reshape(1, C, 1).astype(jnp.float32)
        aff_block = (1, C, 1)

    # VMEM budget: double-buffered input + output blocks + affine tiles + slack.
    block_bytes = TB * n * itemsize
    aff_bytes = int(g3.size) * 4
    needed = 4 * block_bytes + 4 * aff_bytes + (2 << 20)
    vmem_limit = int(min(64 << 20, max(32 << 20, needed)))

    kernel = functools.partial(_group_norm1_kernel, eps=eps, inv_n=1.0 / n)
    out = pl.pallas_call(
        kernel,
        out_shape=jax.ShapeDtypeStruct((B, R, L), x.dtype),
        grid=(B // TB,),
        in_specs=[
            pl.BlockSpec((TB, R, L), lambda i: (i, 0, 0)),
            pl.BlockSpec(aff_block, lambda i: (0, 0, 0)),
            pl.BlockSpec(aff_block, lambda i: (0, 0, 0)),
        ],
        out_specs=pl.BlockSpec((TB, R, L), lambda i: (i, 0, 0)),
        compiler_params=pltpu.CompilerParams(
            dimension_semantics=("parallel",),
            vmem_limit_bytes=vmem_limit,
        ),
    )(x3, g3, b3)
    out = out.reshape(B, C, H, W)

    # TODO(synk): `self.fn` is an arbitrary wrapped module (attention/conv/...);
    # it is applied here as a plain JAX callable.  Fusing an elementwise fn into
    # the kernel epilogue (or the norm into fn's input pipeline) would remove
    # the extra HBM round trip of the normalized activation.
    if fn is not None:
        out = fn(out)
    return out


def _reference(x, weight, bias, fn=None, eps: float = 1e-5):
    """Pure-JAX reference matching torch.nn.GroupNorm(1, C) then fn."""
    B, C, H, W = x.shape
    xf = x.reshape(B, -1).astype(jnp.float32)
    mean = xf.mean(axis=1, keepdims=True)
    var = jnp.mean((xf - mean) ** 2, axis=1, keepdims=True)
    xhat = (xf - mean) / jnp.sqrt(var + eps)
    xhat = xhat.reshape(B, C, H, W)
    out = (xhat * weight.reshape(1, C, 1, 1)
           + bias.reshape(1, C, 1, 1)).astype(x.dtype)
    if fn is not None:
        out = fn(out)
    return out


if __name__ == "__main__":
    key = jax.random.PRNGKey(0)
    kx, kw, kb = jax.random.split(key, 3)

    B, C, H, W = 2, 4, 16, 16
    x = jax.random.normal(kx, (B, C, H, W), dtype=jnp.float32) * 3.0 + 1.5
    weight = jax.random.normal(kw, (C,), dtype=jnp.float32) * 0.5 + 1.0
    bias = jax.random.normal(kb, (C,), dtype=jnp.float32) * 0.1

    fn = lambda y: y  # PreNorm wraps an arbitrary fn; identity for the demo.

    out = pre_norm(x, weight, bias, fn)
    out = jax.block_until_ready(out)

    ref = _reference(x, weight, bias, fn)
    assert out.shape == (B, C, H, W), out.shape
    assert jnp.allclose(out, ref, atol=1e-4, rtol=1e-4), (
        float(jnp.max(jnp.abs(out - ref))))

    print("KERNEL_OK")
</pallas_src>

<mosaic_0001>
module attributes {stable_mosaic.version = 11 : i64} {
  func.func @_group_norm1_kernel(%arg0: i32, %arg1: memref<1x8x128xf32, #tpu.memory_space<vmem>>, %arg2: memref<1x8x128xf32, #tpu.memory_space<vmem>>, %arg3: memref<1x8x128xf32, #tpu.memory_space<vmem>>, %arg4: memref<1x8x128xf32, #tpu.memory_space<vmem>>) attributes {dimension_semantics = [#tpu.dimension_semantics<parallel>], iteration_bounds = array<i64: 2>, scalar_prefetch = 0 : i64, scratch_operands = 0 : i64, tpu.core_type = #tpu.core_type<tc>, window_params = [{transform_indices = @transform_0, window_bounds = array<i64: 1, 8, 128>}, {pipeline_mode = #tpu.pipeline_mode<synchronous>, transform_indices = @transform_1, window_bounds = array<i64: 1, 8, 128>}, {pipeline_mode = #tpu.pipeline_mode<synchronous>, transform_indices = @transform_2, window_bounds = array<i64: 1, 8, 128>}, {transform_indices = @transform_3, window_bounds = array<i64: 1, 8, 128>}]} {
    %c0 = arith.constant 0 : index
    %c0_0 = arith.constant 0 : index
    %c0_1 = arith.constant 0 : index
    %0 = vector.load %arg1[%c0, %c0_0, %c0_1] : memref<1x8x128xf32, #tpu.memory_space<vmem>>, vector<1x8x128xf32>
    %cst = arith.constant dense<0.000000e+00> : vector<1xf32>
    %1 = vector.multi_reduction <add>, %0, %cst [1, 2] : vector<1x8x128xf32> to vector<1xf32>
    %2 = vector.shape_cast %1 : vector<1xf32> to vector<1x1x1xf32>
    %3 = arith.mulf %0, %0 : vector<1x8x128xf32>
    %cst_2 = arith.constant dense<0.000000e+00> : vector<1xf32>
    %4 = vector.multi_reduction <add>, %3, %cst_2 [1, 2] : vector<1x8x128xf32> to vector<1xf32>
    %5 = vector.shape_cast %4 : vector<1xf32> to vector<1x1x1xf32>
    %cst_3 = arith.constant 9.765625E-4 : f32
    %6 = vector.broadcast %cst_3 : f32 to vector<1x1x1xf32>
    %7 = arith.mulf %2, %6 : vector<1x1x1xf32>
    %cst_4 = arith.constant 9.765625E-4 : f32
    %8 = vector.broadcast %cst_4 : f32 to vector<1x1x1xf32>
    %9 = arith.mulf %5, %8 : vector<1x1x1xf32>
    %10 = arith.mulf %7, %7 : vector<1x1x1xf32>
    %11 = arith.subf %9, %10 : vector<1x1x1xf32>
    %cst_5 = arith.constant 0.000000e+00 : f32
    %12 = vector.broadcast %cst_5 : f32 to vector<1x1x1xf32>
    %13 = arith.maximumf %11, %12 : vector<1x1x1xf32>
    %cst_6 = arith.constant 9.99999974E-6 : f32
    %14 = vector.broadcast %cst_6 : f32 to vector<1x1x1xf32>
    %15 = arith.addf %13, %14 : vector<1x1x1xf32>
    %16 = math.rsqrt %15 : vector<1x1x1xf32>
    %c0_7 = arith.constant 0 : index
    %c0_8 = arith.constant 0 : index
    %c0_9 = arith.constant 0 : index
    %17 = vector.load %arg2[%c0_7, %c0_8, %c0_9] : memref<1x8x128xf32, #tpu.memory_space<vmem>>, vector<1x8x128xf32>
    %c0_10 = arith.constant 0 : index
    %c0_11 = arith.constant 0 : index
    %c0_12 = arith.constant 0 : index
    %18 = vector.load %arg3[%c0_10, %c0_11, %c0_12] : memref<1x8x128xf32, #tpu.memory_space<vmem>>, vector<1x8x128xf32>
    %19 = vector.broadcast %16 : vector<1x1x1xf32> to vector<1x8x128xf32>
    %20 = arith.mulf %17, %19 : vector<1x8x128xf32>
    %21 = vector.broadcast %7 : vector<1x1x1xf32> to vector<1x8x128xf32>
    %22 = arith.mulf %21, %20 : vector<1x8x128xf32>
    %23 = arith.subf %18, %22 : vector<1x8x128xf32>
    %24 = arith.mulf %0, %20 : vector<1x8x128xf32>
    %25 = arith.addf %24, %23 : vector<1x8x128xf32>
    %c0_13 = arith.constant 0 : index
    %c0_14 = arith.constant 0 : index
    %c0_15 = arith.constant 0 : index
    %26 = vector.load %arg4[%c0_13, %c0_14, %c0_15] : memref<1x8x128xf32, #tpu.memory_space<vmem>>, vector<1x8x128xf32>
    tpu.vector_store %arg4[%c0_13, %c0_14, %c0_15], %25 {strides = array<i32>} : memref<1x8x128xf32, #tpu.memory_space<vmem>>, vector<1x8x128xf32>,
    return
  }
  func.func @transform_0(%arg0: i32) -> (i32, i32, i32) {
    %c0_i32 = arith.constant 0 : i32
    %c0_i32_0 = arith.constant 0 : i32
    %c0_i32_1 = arith.constant 0 : i32
    return %arg0, %c0_i32, %c0_i32_0 : i32, i32, i32
  }
  func.func @transform_1(%arg0: i32) -> (i32, i32, i32) {
    %c0_i32 = arith.constant 0 : i32
    %c0_i32_0 = arith.constant 0 : i32
    %c0_i32_1 = arith.constant 0 : i32
    %c0_i32_2 = arith.constant 0 : i32
    return %c0_i32, %c0_i32_0, %c0_i32_1 : i32, i32, i32
  }
  func.func @transform_2(%arg0: i32) -> (i32, i32, i32) {
    %c0_i32 = arith.constant 0 : i32
    %c0_i32_0 = arith.constant 0 : i32
    %c0_i32_1 = arith.constant 0 : i32
    %c0_i32_2 = arith.constant 0 : i32
    return %c0_i32, %c0_i32_0, %c0_i32_1 : i32, i32, i32
  }
  func.func @transform_3(%arg0: i32) -> (i32, i32, i32) {
    %c0_i32 = arith.constant 0 : i32
    %c0_i32_0 = arith.constant 0 : i32
    %c0_i32_1 = arith.constant 0 : i32
    return %arg0, %c0_i32, %c0_i32_0 : i32, i32, i32
  }
}

</mosaic_0001>

<bundles_post_ra>
// kernel: tpu_custom_call.1
= control target key start
LH: loop header
LB: loop body
LE: loop exit
PB: predicated region body
PF: predicated region fallthrough
CT: control target
= control target key end

     0   :  { %8 = vsyncpa [#allocation3], 0  ;;  %s775_s0 = inlined_call_operand.hbm [shape: f32[2,8,128], index: 0, kind: input, shape index: {}]   ;;  %s776_s1 = inlined_call_operand.hbm [shape: f32[1,8,128], index: 1, kind: input, shape index: {}]   ;;  %s777_s2 = inlined_call_operand.hbm [shape: f32[1,8,128], index: 2, kind: input, shape index: {}]   ;;  %s778_s3 = inlined_call_operand.hbm [shape: f32[2,8,128], index: 3, kind: output, shape index: {}]  }
   0x1   :  { %10 = vsyncpa [#allocation3 + $0x1], 0 }
   0x2   :  { %11 = vsyncpa [#allocation6], 0 }
   0x3   :  { %12 = vsyncpa [#allocation4], 0 }
   0x4   :  { %14 = vsyncpa [#allocation4 + $0x1], 0  ;;  %s606_s12 = smov 0   ;;  %s608_s13 = smov 0  }
   0x5   :  { %s610_s14 = smov 0   ;;  %s612_s15 = smov 0  }
   0x6 LB: > { %s627_s16 = sadd.s32 4294967295, %s580_s15   ;;  %s347_s17 = sadd.s32 4294967294, %s580_s15   ;;  %s580_s15 = sphi %s612_s15, %s800_s15   ;;  %s576_s14 = sphi %s610_s14, %s799_s14   ;;  %s572_s13 = sphi %s608_s13, %s798_s13   ;;  %s568_s12 = sphi %s606_s12, %s797_s12  }
   0x7   : > { %p40_p0 = scmp.ne.s32.totalorder %s572_s13, %s568_s12  ;;  %p779_p1 = scmp.eq.s32.totalorder %s627_s16, 0 }
   0x8   : > { %p112_p3 = scmp.eq.s32.totalorder %s347_s17, 1  ;;  %p348_p5 = scmp.ge.s32.totalorder %s580_s15, 1 }
   0x9   : > { %p636_p4 = por %p779_p1, %p40_p0  ;;  %p119_p7 = scmp.lt.s32.totalorder %s580_s15, 3 }
   0xa   : > { %p641_p6 = por %p112_p3, %p40_p0  ;;  %s582_s21 = smov [#allocation5]  }
   0xb   : > { %s783_s18 = scalar_select %p636_p4, 1, 0 }
   0xc   : > { %s784_s19 = scalar_select %p641_p6, 1, 0 }
   0xd   : > { %p646_p8 = pnand %p348_p5, %p119_p7  ;;  %s132_s22 = sshll.u32 %s582_s21, 4  ;;  %s133_s22 = int_to_ptr.vmem [resolvable:$true] %s132_s22 }
   0xe   : > { %s583_s23 = smov [#allocation7]   ;;  %s660_s26 = sadd.s32 1, %s580_s15  }
   0xf   : > { %s785_s20 = scalar_select %p646_p8, 1, 0 }
  0x10   : > { %p375_p10 = pneg %p646_p8  ;;  %s143_s24 = sshll.u32 %s583_s23, 4  ;;  %s144_s24 = int_to_ptr.vmem [resolvable:$true] %s143_s24 }
  0x11   : > { %s24_s27 = ssub.s32 %s580_s15, %s660_s26  ;;  %s443_s28 = scalar_lea.vmem %s133_s22, 128 }
  0x12   : > { %p655_p11 = pnand %p375_p10, %p779_p1  ;;  %p444_p13 = scmp.ne.s32.totalorder %s133_s22, %s443_s28 }
  0x13   : > { %p451_p5 = scmp.lt.s32.totalorder %s133_s22, %s133_s22  ;;  %p452_p7 = scmp.lt.s32.totalorder %s443_s28, %s443_s28 }
  0x14   : > { %p434_p12 = pneg %p655_p11 }
  0x15   : > { %p453_p10 = por %p452_p7, %p451_p5 }
  0x16   : > { %p446_p0 = pnand %p444_p13, %p434_p12 }
  0x18   : > { %p447_p3 = pneg %p446_p0 }
  0x1a   : > { %p454_p9 = pnand %p453_p10, %p447_p3 }
  0x1c   : > { %457 = shalt.err (!%p454_p9)
}
  0x1d   : > { %378 = dma.hbm_to_vmem [thread:$0]  (!%p655_p11), %s776_s1, 128, %s133_s22, [#allocation6]  }
  0x1e   : > { %s469_s4 = scalar_lea.vmem %s144_s24, 128  ;;  %p477_p13 = scmp.lt.s32.totalorder %s144_s24, %s144_s24 }
  0x1f   : > { %p470_p1 = scmp.ne.s32.totalorder %s144_s24, %s469_s4  ;;  %p478_p0 = scmp.lt.s32.totalorder %s469_s4, %s469_s4 }
  0x21   : > { %p472_p2 = pnand %p470_p1, %p434_p12  ;;  %p479_p4 = por %p478_p0, %p477_p13 }
  0x23   : > { %p473_p6 = pneg %p472_p2 }
  0x25   : > { %p480_p8 = pnand %p479_p4, %p473_p6 }
  0x27   : > { %483 = shalt.err (!%p480_p8)
}
  0x28   : > { %381 = dma.hbm_to_vmem [thread:$0]  (!%p655_p11), %s777_s2, 128, %s144_s24, [#allocation6]  }
  0x29   : > { %p25_p1 = scmp.eq.s32.totalorder %s24_s27, 0  ;;  %s27_s7 = sadd.s32 1, %s576_s14 }
  0x2a   : > { %p34_p2 = scmp.ne.s32.totalorder %s576_s14, %s572_s13  ;;  %p35_p4 = scmp.eq.s32.totalorder %s580_s15, 0 }
  0x2b   : > { %s687_s8 = scalar_select %p25_p1, %s576_s14, %s27_s7  }
  0x2c   : > { %p36_p6 = por %p35_p4, %p34_p2  ;;  %p787_p8 = scmp.eq.s32.totalorder %s627_s16, 1 }
  0x2d   : > { %p392_p12 = scmp.lt.s32.totalorder %s580_s15, 2  ;;  %s154_s10 = sand.u32 1, %s576_s14  }
  0x2e   : > { %p691_p9 = por %p787_p8, %p34_p2  ;;  %s352_s11 = sshll.u32 %s154_s10, 3 }
  0x2f   : > { %s353_s17 = sshll.u32 %s580_s15, 7  ;;  %s158_s24 = scalar_lea.vmem [#allocation2], %s352_s11 }
  0x30   : > { %s788_s9 = scalar_select %p691_p9, 1, 0 }
  0x31   : > { %s701_s23 = scalar_lea.hbm %s775_s0, %s353_s17  ;;  %s165_s25 = sshll.u32 %s158_s24, 4  ;;  %s166_s25 = int_to_ptr.vmem [resolvable:$true] %s165_s25 }
  0x32   : > { %p703_p11 = pnand %p392_p12, %p36_p6  ;;  %s155_s28 = scalar_lea.sflag [#allocation3], %s154_s10 }
  0x33   : > { %s484_s29 = scalar_lea.hbm %s701_s23, 128  ;;  %s489_s5 = scalar_lea.hbm %s775_s0, 256 }
  0x34   : > { %p485_p3 = scmp.ne.s32.totalorder %s701_s23, %s484_s29  ;;  %p486_p5 = pneg %p703_p11 }
  0x35   : > { %p490_p13 = scmp.lt.s32.totalorder %s701_s23, %s775_s0  ;;  %p491_p0 = scmp.lt.s32.totalorder %s489_s5, %s484_s29 }
  0x36   : > { %p487_p7 = pnand %p486_p5, %p485_p3 }
  0x37   : > { %p492_p1 = por %p491_p0, %p490_p13 }
  0x38   : > { %p488_p10 = pneg %p487_p7 }
  0x3a   : > { %p493_p2 = pnand %p492_p1, %p488_p10 }
  0x3c   : > { %496 = shalt.err (!%p493_p2)
}
  0x3d   : > { %s497_s11 = scalar_lea.vmem %s166_s25, 128  ;;  %s584_s10 = smov [#allocation2]  }
  0x3e   : > { %p498_p4 = scmp.ne.s32.totalorder %s166_s25, %s497_s11  ;;  %s502_s17 = sshll.u32 %s584_s10, 4  ;;  %s503_s17 = int_to_ptr.vmem [resolvable:$false] %s502_s17 }
  0x3f   : > { %s504_s21 = scalar_lea.vmem %s503_s17, 256  ;;  %p505_p12 = scmp.lt.s32.totalorder %s166_s25, %s503_s17 }
  0x40   : > { %p500_p6 = pnand %p498_p4, %p486_p5  ;;  %p506_p3 = scmp.lt.s32.totalorder %s504_s21, %s497_s11 }
  0x42   : > { %p501_p8 = pneg %p500_p6  ;;  %p507_p7 = por %p506_p3, %p505_p12 }
  0x44   : > { %p508_p9 = pnand %p507_p7, %p501_p8 }
  0x46   : > { %511 = shalt.err (!%p508_p9)
}
  0x47   : > { %385 = dma.hbm_to_vmem [thread:$0]  (!%p703_p11), %s701_s23, 128, %s166_s25, %s155_s28  }
  0x48   : > { %p790_p10 = scmp.ne.s32.totalorder %s785_s20, 0 }
  0x49   : > { %s724_s22 = sand.u32 (!%p790_p10), 1, %s572_s13   ;;  %p791_p5 = scmp.ne.s32.totalorder (!%p790_p10), %s783_s18, 0 }
  0x4a   : > { %174 = sbr.rel (%p790_p10) target bundleno = 281 (0x119), region = 32  ;;  %s355_s24 = sshll.u32 (!%p790_p10), %s724_s22, 3 }
  0x4b   : > { %s177_s29 = scalar_lea.sflag (!%p790_p10), [#allocation3], %s724_s22  ;;  %s180_s30 = scalar_lea.vmem (!%p790_p10), [#allocation2], %s355_s24 }
  0x4f   : > { %555 = dma.done.wait (%p791_p5), %s177_s29, 128  }
  0x50   : > { %557 = vsyncadd (%p791_p5), %s177_s29, 4294967168  ;;  %p792_p9 = scmp.eq.s32.totalorder %s627_s16, 0 }
  0x52   : > { %559 = dma.done.wait (%p792_p9), [#allocation6], 256   ;;  %p793_p11 = pmov %p792_p9 }
  0x53   : > { %v211_v0 = vld [vmem:[%s180_s30] sm:$0xff]  ;;  %v236_v22 = vld [vmem:[#allocation5] sm:$0xff]  ;;  %v237_v25 = vld [vmem:[#allocation7] sm:$0xff]  ;;  %s360_s18 = sshll.u32 %s627_s16, 7  ;;  %s210_s20 = scalar_lea.vmem [#allocation8], %s355_s24 }
  0x54   : > { %561 = vsyncadd (%p793_p11), [#allocation6], 4294967040  ;;  %212 = vadd.xlane.f32.xlu0 %v211_v0  ;;  %v220_v1 = vmul.f32 %v211_v0, %v211_v0  ;;  %s258_s23 = sshll.u32 %s210_s20, 4  ;;  %s256_s28 = scalar_lea.hbm %s778_s3, %s360_s18  ;;  %s259_s23 = int_to_ptr.vmem [resolvable:$true] %s258_s23 }
  0x55   : > { %s245_s4 = scalar_lea.sflag [#allocation4], %s724_s22  ;;  %s512_s5 = scalar_lea.vmem %s259_s23, 128 }
  0x56   : > { %p513_p13 = scmp.ne.s32.totalorder %s259_s23, %s512_s5  ;;  %p794_p0 = scmp.ne.s32.totalorder %s788_s9, 0 }
  0x57   : > { %s585_s6 = smov [#allocation8]  }
  0x58   : > { %221 = vadd.xlane.f32.xlu0 %v220_v1  ;;  %p514_p1 = pnand %p513_p13, %p794_p0  ;;  %s516_s16 = sshll.u32 %s585_s6, 4  ;;  %s517_s16 = int_to_ptr.vmem [resolvable:$false] %s516_s16 }
  0x59   : > { %s518_s7 = scalar_lea.vmem %s517_s16, 256  ;;  %p519_p4 = scmp.lt.s32.totalorder %s259_s23, %s517_s16 }
  0x5a   : > { %p515_p2 = pneg %p514_p1  ;;  %p520_p6 = scmp.lt.s32.totalorder %s518_s7, %s512_s5 }
  0x5c   : > { %p521_p8 = por %p520_p6, %p519_p4 }
  0x5e   : > { %p522_p12 = pnand %p521_p8, %p515_p2 }
  0xdd   : > { %v213_v2 = vpop.xlane.xlu0 %212 }
  0xde   : > { %v214_v3 = vrot.slane %v213_v2, 4 }
  0xe0   : > { %v215_v4 = vadd.f32 %v214_v3, %v213_v2 }
  0xe1   : > { %v222_v5 = vpop.xlane.xlu0 %221 }
  0xe2   : > { %v216_v6 = vrot.slane %v215_v4, 2  ;;  %v223_v7 = vrot.slane %v222_v5, 4 }
  0xe4   : > { %v217_v8 = vadd.f32 %v216_v6, %v215_v4  ;;  %v224_v9 = vadd.f32 %v223_v7, %v222_v5 }
  0xe6   : > { %v218_v10 = vrot.slane %v217_v8, 1  ;;  %v225_v11 = vrot.slane %v224_v9, 2 }
  0xe8   : > { %v219_v12 = vadd.f32 %v218_v10, %v217_v8  ;;  %v226_v13 = vadd.f32 %v225_v11, %v224_v9 }
  0xea   : > { %v229_v14 = vmul.f32 0.0009765625, %v219_v12  ;;  %v227_v15 = vrot.slane %v226_v13, 1 }
  0xec   : > { %v228_v16 = vadd.f32 %v227_v15, %v226_v13  ;;  %v231_v17 = vmul.f32 %v229_v14, %v229_v14 }
  0xee   : > { %v230_v18 = vmul.f32 0.0009765625, %v228_v16 }
  0xf0   : > { %v232_v19 = vsub.f32 %v230_v18, %v231_v17 }
  0xf2   : > { %v233_v20 = vmax.f32 %v232_v19, 0.0 }
  0xf4   : > { %v234_v21 = vadd.f32 1e-05, %v233_v20 }
  0xf6   : > { %430 = vrsqrt.f32 %v234_v21 }
 0x103   : > { %v431_v23 = vpop.eup %430 }
 0x104   : > { %v238_v24 = vmul.f32 %v431_v23, %v236_v22 }
 0x106   : > { %v239_v26 = vmul.f32 %v238_v24, %v229_v14  ;;  %v241_v28 = vmul.f32 %v238_v24, %v211_v0 }
 0x108   : > { %v240_v27 = vsub.f32 %v237_v25, %v239_v26 }
 0x10a   : > { %v242_v29 = vadd.f32 %v241_v28, %v240_v27 }
 0x10c   : > { %243 = vst [vmem:[%s210_s20] sm:$0xff] %v242_v29 }
 0x10d   : > { %525 = shalt.err (!%p522_p12)
}
 0x10e   : > { %s526_s11 = scalar_lea.hbm %s256_s28, 128  ;;  %s530_s21 = scalar_lea.hbm %s778_s3, 256 }
 0x10f   : > { %p527_p3 = scmp.ne.s32.totalorder %s256_s28, %s526_s11  ;;  %p531_p5 = scmp.lt.s32.totalorder %s256_s28, %s778_s3 }
 0x110   : > { %p532_p9 = scmp.lt.s32.totalorder %s530_s21, %s526_s11 }
 0x111   : > { %p528_p7 = pnand %p527_p3, %p794_p0 }
 0x112   : > { %p533_p11 = por %p532_p9, %p531_p5 }
 0x113   : > { %p529_p10 = pneg %p528_p7 }
 0x115   : > { %p534_p13 = pnand %p533_p11, %p529_p10 }
 0x117   : > { %537 = shalt.err (!%p534_p13)
}
 0x118   : > { %373 = dma.vmem_to_hbm [thread:$0]  (%p794_p0), %s259_s23, 128, %s256_s28, %s245_s4  }
 0x119 PF: > { %s270_s29 = sand.u32 1, %s568_s12   ;;  %p795_p1 = scmp.ne.s32.totalorder %s784_s19, 0 }
 0x11a   : > { %p796_p2 = scmp.ge.s32.totalorder %s580_s15, 2  ;;  %s271_s30 = scalar_lea.sflag [#allocation4], %s270_s29 }
 0x11c   : > { %p387_p4 = pnand %p796_p2, %p795_p1 }
 0x11e   : > { %p388_p6 = pneg %p387_p4 }
 0x120   : > { %563 = dma.done.wait (%p388_p6), %s271_s30, 128  }
 0x121   : > { %565 = vsyncadd (%p388_p6), %s271_s30, 4294967168  ;;  %p17_p8 = scmp.ge.s32.totalorder %s660_s26, 4   ;;  %s797_s12 = smov %s572_s13 }
 0x122   : > { %s798_s13 = smov %s576_s14  ;;  %s799_s14 = smov %s687_s8 }
 0x123   : > { %s800_s15 = smov %s660_s26  ;;  %19 = sbr.rel (!%p17_p8) target bundleno = 6 (0x6), region = 85 }
 0x128   :  { %276 = vsyncpa [#allocation3], 1 }
 0x129   :  { %278 = vsyncpa [#allocation3 + $0x1], 1 }
 0x12a   :  { %279 = vsyncpa [#allocation6], 1 }
 0x12b   :  { %280 = vsyncpa [#allocation4], 1 }
 0x12c   :  { %282 = vsyncpa [#allocation4 + $0x1], 1 }

</bundles_post_ra>
